<compile_context>
chip_gen: v7x
topology: tpu7x:2x2x1
jax: 0.10.0
libtpu: 0.0.40
codegen_flags: <defaults>
</compile_context>

<pallas_src>
import functools

import numpy as np
import jax
import jax.numpy as jnp
from jax.experimental import pallas as pl
from jax.experimental.pallas import tpu as pltpu

try:
    from scipy.optimize import linear_sum_assignment as _scipy_lsa
except Exception:  # pragma: no cover
    _scipy_lsa = None


_BIG = 1e32                              # masked_fill value, same as torch reference
_SINGLE_BLOCK_BYTES = 2 * 1024 * 1024    # one (P_pad, T_pad) f32 block per batch elem up to 2 MiB


# ----------------------------------------------------------------------------
# Tiling helpers
# ----------------------------------------------------------------------------
def _round_up(x, m):
    return ((x + m - 1) // m) * m


def _pick_tile(n, base, max_tile):
    """Return (tile, padded) with tile % base == 0 and padded % tile == 0.

    Prefers the largest candidate tile whose padding overhead stays within 2x
    of the minimum (padded columns/rows only hit the cheap dead-tile fill)."""
    n_pad = _round_up(max(int(n), 1), base)
    if n_pad <= max_tile:
        return n_pad, n_pad
    cands = []
    for t in (max_tile, max_tile // 2, max_tile // 4):
        if t >= base and t % base == 0:
            cands.append((t, _round_up(n_pad, t)))
    min_pad = min(padded for _, padded in cands)
    return max((t, padded) for t, padded in cands if padded <= 2.0 * min_pad)


# ----------------------------------------------------------------------------
# Pallas kernel: masked pairwise Minkowski distance (torch.cdist + masked_fill)
# ----------------------------------------------------------------------------
def _masked_cdist_kernel(pred_lens_ref, target_lens_ref,   # scalar prefetch (SMEM)
                         pred_ref, tgt_ref,                 # VMEM: (1,TP,D), (1,D,TT)
                         cost_ref,                          # VMEM: (1,TP,TT)
                         *, p, tiled):
    b = pl.program_id(0)
    pi = pl.program_id(1) if tiled else 0
    ti = pl.program_id(2) if tiled else 0

    TP = cost_ref.shape[1]
    TT = cost_ref.shape[2]
    D = pred_ref.shape[2]

    plen = pred_lens_ref[b]
    tlen = target_lens_ref[b]
    row_start = pi * TP
    col_start = ti * TT

    live = jnp.logical_and(row_start < plen, col_start < tlen)

    @pl.when(live)
    def _compute():
        pred_f = pred_ref[0].astype(jnp.float32)   # (TP, D)
        tgt_f = tgt_ref[0].astype(jnp.float32)     # (D, TT) — T on the lane axis

        # Validity mask from thin iotas (broadcast to (TP, TT) inside where).
        row_ids = jax.lax.broadcasted_iota(jnp.int32, (TP, 1), 0) + row_start
        col_ids = jax.lax.broadcasted_iota(jnp.int32, (1, TT), 1) + col_start
        valid = jnp.logical_and(row_ids < plen, col_ids < tlen)

        if p == 2 and D > 8:
            # MXU decomposition: ||x - y||^2 = ||x||^2 + ||y||^2 - 2 x.y
            pn = jnp.sum(pred_f * pred_f, axis=1, keepdims=True)       # (TP, 1)
            tn = jnp.sum(tgt_f * tgt_f, axis=0, keepdims=True)         # (1, TT)
            dot = jnp.dot(pred_f, tgt_f, preferred_element_type=jnp.float32)
            cost = jnp.sqrt(jnp.maximum(pn + tn - 2.0 * dot, 0.0))
        else:
            # Lane-dense accumulation over the (small, static) feature dim.
            # Accumulate a *traced* value and write cost_ref exactly once —
            # no per-d VMEM round-trip through the output ref.
            p_int = int(p) if float(p) == float(int(p)) else None
            cost = None
            for d in range(D):
                diff = jnp.abs(pred_f[:, d:d + 1] - tgt_f[d:d + 1, :])  # (TP, TT)
                if p_int is not None and p_int > 1:
                    term = diff
                    for _ in range(p_int - 1):     # integer pow via multiplies (no EUP pow)
                        term = term * diff
                    diff = term
                elif p_int is None:
                    diff = diff ** p
                cost = diff if cost is None else cost + diff
            if p == 2:
                cost = jnp.sqrt(cost)              # exact per-dim path (no cancellation)
            elif p != 1:
                cost = cost ** (1.0 / p)
        cost_ref[0] = jnp.where(valid, cost, jnp.float32(_BIG))

    @pl.when(jnp.logical_not(live))
    def _fill():
        # Tile entirely past the valid lengths: skip compute, store the fill.
        cost_ref[...] = jnp.full(cost_ref.shape, _BIG, jnp.float32)


def _masked_cdist_padded(pred, target, pred_lens, target_lens, p=1):
    """cost[b,i,j] = ||pred[b,i] - target[b,j]||_p (invalid entries = 1e32).
    Returns the (8,128)-padded cost of shape (B, P_pad, T_pad)."""
    B, P, D = pred.shape
    _, T, _ = target.shape

    P_pad = _round_up(max(P, 1), 8)
    T_pad = _round_up(max(T, 1), 128)
    single_block = P_pad * T_pad * 4 <= _SINGLE_BLOCK_BYTES

    if single_block:
        TP, TT = P_pad, T_pad
    else:
        TP, P_pad = _pick_tile(P, 8, 256)       # sublane axis of the output tile
        TT, T_pad = _pick_tile(T, 128, 1024)    # lane axis of the output tile

    if P_pad != P:
        pred = jnp.pad(pred, ((0, 0), (0, P_pad - P), (0, 0)))
    target_t = jnp.swapaxes(target, 1, 2)                     # (B, D, T): T on lanes
    if T_pad != T:
        target_t = jnp.pad(target_t, ((0, 0), (0, 0), (0, T_pad - T)))

    if single_block:
        # One full (P_pad, T_pad) block per batch element: fewest grid steps,
        # widest unmasked stores, input DMAs amortized over the whole block.
        grid = (B,)
        in_specs = [
            pl.BlockSpec((1, TP, D), lambda b, plen, tlen: (b, 0, 0)),
            pl.BlockSpec((1, D, TT), lambda b, plen, tlen: (b, 0, 0)),
        ]
        out_spec = pl.BlockSpec((1, TP, TT), lambda b, plen, tlen: (b, 0, 0))
        dims = ("parallel",)
    else:
        grid = (B, P_pad // TP, T_pad // TT)
        in_specs = [
            pl.BlockSpec((1, TP, D), lambda b, i, j, plen, tlen: (b, i, 0)),
            pl.BlockSpec((1, D, TT), lambda b, i, j, plen, tlen: (b, 0, j)),
        ]
        out_spec = pl.BlockSpec((1, TP, TT), lambda b, i, j, plen, tlen: (b, i, j))
        # Every (b, i, j) writes a distinct output block (no accumulator), so all
        # axes can be sharded across TensorCores (helps v7x megacore balance).
        dims = ("parallel", "parallel", "parallel")
    # NOTE: output stays at the default double-buffering; pl.Buffered(3) is an
    # optional follow-up if the writeback DMA shows up exposed in traces.

    grid_spec = pltpu.PrefetchScalarGridSpec(
        num_scalar_prefetch=2,
        grid=grid,
        in_specs=in_specs,
        out_specs=out_spec,
    )

    return pl.pallas_call(
        functools.partial(_masked_cdist_kernel, p=p, tiled=not single_block),
        grid_spec=grid_spec,
        out_shape=jax.ShapeDtypeStruct((B, P_pad, T_pad), jnp.float32),
        compiler_params=pltpu.CompilerParams(
            dimension_semantics=dims,
            vmem_limit_bytes=32 * 1024 * 1024),
    )(pred_lens.astype(jnp.int32), target_lens.astype(jnp.int32), pred, target_t)


def masked_cdist_pallas(pred, target, pred_lens, target_lens, p=1):
    """Unpadded (B, P, T) masked cost matrix (for testing / direct use)."""
    P = pred.shape[1]
    T = target.shape[1]
    cost_pad = _masked_cdist_padded(pred, target, pred_lens, target_lens, p=p)
    return cost_pad[:, :P, :T]


# ----------------------------------------------------------------------------
# Host-side linear assignment (replaces torch-linear-assignment's
# batch_linear_assignment).  Rows <= cols is guaranteed by the transpose logic.
# ----------------------------------------------------------------------------
def _hungarian_rows(cost):
    """Classic O(n^2*m) Hungarian.  cost: (n, m) with n <= m.
    Returns length-n int array: column assigned to each row."""
    n, m = cost.shape
    INF = float("inf")
    u = np.zeros(n + 1, dtype=np.float64)
    v = np.zeros(m + 1, dtype=np.float64)
    p_arr = np.zeros(m + 1, dtype=np.int64)   # p_arr[j] = row matched to col j (1-based)
    way = np.zeros(m + 1, dtype=np.int64)
    for i in range(1, n + 1):
        p_arr[0] = i
        j0 = 0
        minv = np.full(m + 1, INF, dtype=np.float64)
        used = np.zeros(m + 1, dtype=bool)
        while True:
            used[j0] = True
            i0 = p_arr[j0]
            delta = INF
            j1 = -1
            for j in range(1, m + 1):
                if not used[j]:
                    cur = cost[i0 - 1, j - 1] - u[i0] - v[j]
                    if cur < minv[j]:
                        minv[j] = cur
                        way[j] = j0
                    if minv[j] < delta:
                        delta = minv[j]
                        j1 = j
            for j in range(m + 1):
                if used[j]:
                    u[p_arr[j]] += delta
                    v[j] -= delta
                else:
                    minv[j] -= delta
            j0 = j1
            if p_arr[j0] == 0:
                break
        while True:
            j1 = way[j0]
            p_arr[j0] = p_arr[j1]
            j0 = j1
            if j0 == 0:
                break
    ans = np.full(n, -1, dtype=np.int64)
    for j in range(1, m + 1):
        if p_arr[j] != 0:
            ans[p_arr[j] - 1] = j - 1
    return ans


def _solve_rows(cost):
    """cost: (n, m) with n <= m.  Returns the column assigned to each row."""
    n = cost.shape[0]
    if _scipy_lsa is not None:
        rows, cols = _scipy_lsa(cost)
        ans = np.full(n, -1, dtype=np.int64)
        ans[rows] = cols
        return ans
    return _hungarian_rows(cost)


# ----------------------------------------------------------------------------
# Full HungarianMatcher.forward equivalent
# ----------------------------------------------------------------------------
def hungarian_matcher(pred, target, pred_lens, target_lens, p=1):
    B, P, _ = pred.shape
    T = target.shape[1]

    cost_pad = _masked_cdist_padded(pred, target, pred_lens, target_lens, p=p)
    cost = np.asarray(jax.block_until_ready(cost_pad))[:, :P, :T].astype(np.float64)

    pred_lens_np = np.asarray(pred_lens).astype(np.int64)
    target_lens_np = np.asarray(target_lens).astype(np.int64)

    transposed = T < P
    if transposed:
        work = np.transpose(cost, (0, 2, 1))   # rows = target, cols = pred
        row_lens = target_lens_np
    else:
        work = cost                            # rows = pred, cols = target
        row_lens = pred_lens_np
    W = work.shape[1]

    assignments = np.stack([_solve_rows(work[b]) for b in range(B)], axis=0)
    row_mask = np.arange(W)[None, :] < row_lens[:, None]
    assignments[~row_mask] = -1

    # assignment_to_indices (vectorized on host)
    batch_idx = np.broadcast_to(np.arange(B)[:, None], (B, W)).reshape(-1)
    row_idx = np.broadcast_to(np.arange(W)[None, :], (B, W)).reshape(-1)
    col_idx = assignments.reshape(-1)
    m = col_idx >= 0
    valid_batch = batch_idx[m]
    valid_rows = row_idx[m]
    valid_cols = col_idx[m]

    if transposed:
        valid_pred_indices, valid_target_indices = valid_cols, valid_rows
    else:
        valid_pred_indices, valid_target_indices = valid_rows, valid_cols
    return valid_batch, valid_pred_indices, valid_target_indices


# ----------------------------------------------------------------------------
if __name__ == "__main__":
    key = jax.random.PRNGKey(0)
    k1, k2, k3, k4, k5, k6 = jax.random.split(key, 6)

    def ref_cost(pred, target, pred_lens, target_lens, p):
        d = jnp.abs(pred[:, :, None, :] - target[:, None, :, :])
        if p == 1:
            c = jnp.sum(d, axis=-1)
        else:
            c = jnp.sum(d ** p, axis=-1) ** (1.0 / p)
        Pm, Tm = pred.shape[1], target.shape[1]
        valid = ((jnp.arange(Pm)[None, :, None] < pred_lens[:, None, None]) &
                 (jnp.arange(Tm)[None, None, :] < target_lens[:, None, None]))
        return jnp.where(valid, c, _BIG)

    # --- test 1: small shapes, single-block path, p=1 and p=2 -----------------
    B, P, T, D = 2, 8, 6, 32
    pred = jax.random.normal(k1, (B, P, D), dtype=jnp.float32)
    target = jax.random.normal(k2, (B, T, D), dtype=jnp.float32)
    pred_lens = jnp.array([8, 5], dtype=jnp.int32)
    target_lens = jnp.array([6, 4], dtype=jnp.int32)

    got1 = jax.block_until_ready(
        masked_cdist_pallas(pred, target, pred_lens, target_lens, p=1))
    np.testing.assert_allclose(
        np.asarray(got1), np.asarray(ref_cost(pred, target, pred_lens, target_lens, 1)),
        rtol=1e-5, atol=1e-4)

    got2 = jax.block_until_ready(
        masked_cdist_pallas(pred, target, pred_lens, target_lens, p=2))
    np.testing.assert_allclose(
        np.asarray(got2), np.asarray(ref_cost(pred, target, pred_lens, target_lens, 2)),
        rtol=2e-3, atol=2e-3)

    # --- test 2: point-cloud shapes (D=3), one full block per batch element ----
    Pb, Tb, Db = 300, 600, 3
    pred_b = jax.random.normal(k3, (B, Pb, Db), dtype=jnp.float32)
    target_b = jax.random.normal(k4, (B, Tb, Db), dtype=jnp.float32)
    plens_b = jnp.array([300, 70], dtype=jnp.int32)
    tlens_b = jnp.array([600, 10], dtype=jnp.int32)
    got_b = jax.block_until_ready(
        masked_cdist_pallas(pred_b, target_b, plens_b, tlens_b, p=1))
    np.testing.assert_allclose(
        np.asarray(got_b), np.asarray(ref_cost(pred_b, target_b, plens_b, tlens_b, 1)),
        rtol=1e-5, atol=1e-4)

    # --- test 3: larger shapes -> tiled fallback path + dead-tile fill ---------
    Pc, Tc, Dc = 600, 1100, 3
    pred_c = jax.random.normal(k5, (B, Pc, Dc), dtype=jnp.float32)
    target_c = jax.random.normal(k6, (B, Tc, Dc), dtype=jnp.float32)
    plens_c = jnp.array([600, 200], dtype=jnp.int32)
    tlens_c = jnp.array([1100, 300], dtype=jnp.int32)
    got_c = jax.block_until_ready(
        masked_cdist_pallas(pred_c, target_c, plens_c, tlens_c, p=1))
    np.testing.assert_allclose(
        np.asarray(got_c), np.asarray(ref_cost(pred_c, target_c, plens_c, tlens_c, 1)),
        rtol=1e-5, atol=1e-4)

    # --- full matcher forward --------------------------------------------------
    bi, pi_, ti_ = hungarian_matcher(pred, target, pred_lens, target_lens, p=1)
    assert np.all(np.asarray(pred_lens)[bi] > pi_)
    assert np.all(np.asarray(target_lens)[bi] > ti_)
    assert len(ti_) == int(np.sum(np.asarray(target_lens)))  # every valid target matched

    print("KERNEL_OK")
</pallas_src>

<mosaic_0001>
module attributes {stable_mosaic.version = 11 : i64} {
  func.func @_masked_cdist_kernel(%arg0: i32, %arg1: memref<2xi32, #tpu.memory_space<smem>>, %arg2: memref<2xi32, #tpu.memory_space<smem>>, %arg3: memref<1x8x32xf32, #tpu.memory_space<vmem>>, %arg4: memref<1x32x128xf32, #tpu.memory_space<vmem>>, %arg5: memref<1x8x128xf32, #tpu.memory_space<vmem>>) attributes {dimension_semantics = [#tpu.dimension_semantics<parallel>], iteration_bounds = array<i64: 2>, scalar_prefetch = 2 : i64, scratch_operands = 0 : i64, tpu.core_type = #tpu.core_type<tc>, window_params = [{transform_indices = @transform_0, window_bounds = array<i64: 1, 8, 32>}, {transform_indices = @transform_1, window_bounds = array<i64: 1, 32, 128>}, {transform_indices = @transform_2, window_bounds = array<i64: 1, 8, 128>}]} {
    %0 = arith.index_cast %arg0 : i32 to index
    %1 = memref.load %arg1[%0] : memref<2xi32, #tpu.memory_space<smem>>
    %2 = arith.index_cast %arg0 : i32 to index
    %3 = memref.load %arg2[%2] : memref<2xi32, #tpu.memory_space<smem>>
    %c0_i32 = arith.constant 0 : i32
    %4 = arith.cmpi sgt, %1, %c0_i32 : i32
    %c0_i32_0 = arith.constant 0 : i32
    %5 = arith.cmpi sgt, %3, %c0_i32_0 : i32
    %6 = arith.andi %4, %5 : i1
    %7 = arith.extui %6 : i1 to i32
    %c0_i32_1 = arith.constant 0 : i32
    %8 = arith.cmpi ne, %7, %c0_i32_1 : i32
    scf.if %8 {
      %c0 = arith.constant 0 : index
      %c0_3 = arith.constant 0 : index
      %c0_4 = arith.constant 0 : index
      %12 = vector.load %arg3[%c0, %c0_3, %c0_4] : memref<1x8x32xf32, #tpu.memory_space<vmem>>, vector<1x8x32xf32>
      %13 = vector.shape_cast %12 : vector<1x8x32xf32> to vector<8x32xf32>
      %c0_5 = arith.constant 0 : index
      %c0_6 = arith.constant 0 : index
      %c0_7 = arith.constant 0 : index
      %14 = vector.load %arg4[%c0_5, %c0_6, %c0_7] : memref<1x32x128xf32, #tpu.memory_space<vmem>>, vector<1x32x128xf32>
      %15 = vector.shape_cast %14 : vector<1x32x128xf32> to vector<32x128xf32>
      %16 = tpu.iota {dimensions = array<i32: 0>} : vector<8x1xi32>
      %c0_i32_8 = arith.constant 0 : i32
      %17 = vector.broadcast %c0_i32_8 : i32 to vector<8x1xi32>
      %18 = arith.addi %16, %17 : vector<8x1xi32>
      %19 = tpu.iota {dimensions = array<i32: 1>} : vector<1x128xi32>
      %c0_i32_9 = arith.constant 0 : i32
      %20 = vector.broadcast %c0_i32_9 : i32 to vector<1x128xi32>
      %21 = arith.addi %19, %20 : vector<1x128xi32>
      %22 = vector.broadcast %1 : i32 to vector<8x1xi32>
      %23 = arith.cmpi slt, %18, %22 : vector<8x1xi32>
      %24 = vector.broadcast %3 : i32 to vector<1x128xi32>
      %25 = arith.cmpi slt, %21, %24 : vector<1x128xi32>
      %26 = vector.broadcast %23 : vector<8x1xi1> to vector<8x128xi1>
      %27 = vector.broadcast %25 : vector<1x128xi1> to vector<8x128xi1>
      %28 = arith.andi %26, %27 : vector<8x128xi1>
      %29 = vector.extract_strided_slice %13 {offsets = [0, 0], sizes = [8, 1], strides = [1, 1]} : vector<8x32xf32> to vector<8x1xf32>
      %30 = vector.extract_strided_slice %15 {offsets = [0, 0], sizes = [1, 128], strides = [1, 1]} : vector<32x128xf32> to vector<1x128xf32>
      %31 = vector.broadcast %29 : vector<8x1xf32> to vector<8x128xf32>
      %32 = vector.broadcast %30 : vector<1x128xf32> to vector<8x128xf32>
      %33 = arith.subf %31, %32 : vector<8x128xf32>
      %34 = math.absf %33 : vector<8x128xf32>
      %35 = vector.extract_strided_slice %13 {offsets = [0, 1], sizes = [8, 1], strides = [1, 1]} : vector<8x32xf32> to vector<8x1xf32>
      %36 = vector.extract_strided_slice %15 {offsets = [1, 0], sizes = [1, 128], strides = [1, 1]} : vector<32x128xf32> to vector<1x128xf32>
      %37 = vector.broadcast %35 : vector<8x1xf32> to vector<8x128xf32>
      %38 = vector.broadcast %36 : vector<1x128xf32> to vector<8x128xf32>
      %39 = arith.subf %37, %38 : vector<8x128xf32>
      %40 = math.absf %39 : vector<8x128xf32>
      %41 = arith.addf %34, %40 : vector<8x128xf32>
      %42 = vector.extract_strided_slice %13 {offsets = [0, 2], sizes = [8, 1], strides = [1, 1]} : vector<8x32xf32> to vector<8x1xf32>
      %43 = vector.extract_strided_slice %15 {offsets = [2, 0], sizes = [1, 128], strides = [1, 1]} : vector<32x128xf32> to vector<1x128xf32>
      %44 = vector.broadcast %42 : vector<8x1xf32> to vector<8x128xf32>
      %45 = vector.broadcast %43 : vector<1x128xf32> to vector<8x128xf32>
      %46 = arith.subf %44, %45 : vector<8x128xf32>
      %47 = math.absf %46 : vector<8x128xf32>
      %48 = arith.addf %41, %47 : vector<8x128xf32>
      %49 = vector.extract_strided_slice %13 {offsets = [0, 3], sizes = [8, 1], strides = [1, 1]} : vector<8x32xf32> to vector<8x1xf32>
      %50 = vector.extract_strided_slice %15 {offsets = [3, 0], sizes = [1, 128], strides = [1, 1]} : vector<32x128xf32> to vector<1x128xf32>
      %51 = vector.broadcast %49 : vector<8x1xf32> to vector<8x128xf32>
      %52 = vector.broadcast %50 : vector<1x128xf32> to vector<8x128xf32>
      %53 = arith.subf %51, %52 : vector<8x128xf32>
      %54 = math.absf %53 : vector<8x128xf32>
      %55 = arith.addf %48, %54 : vector<8x128xf32>
      %56 = vector.extract_strided_slice %13 {offsets = [0, 4], sizes = [8, 1], strides = [1, 1]} : vector<8x32xf32> to vector<8x1xf32>
      %57 = vector.extract_strided_slice %15 {offsets = [4, 0], sizes = [1, 128], strides = [1, 1]} : vector<32x128xf32> to vector<1x128xf32>
      %58 = vector.broadcast %56 : vector<8x1xf32> to vector<8x128xf32>
      %59 = vector.broadcast %57 : vector<1x128xf32> to vector<8x128xf32>
      %60 = arith.subf %58, %59 : vector<8x128xf32>
      %61 = math.absf %60 : vector<8x128xf32>
      %62 = arith.addf %55, %61 : vector<8x128xf32>
      %63 = vector.extract_strided_slice %13 {offsets = [0, 5], sizes = [8, 1], strides = [1, 1]} : vector<8x32xf32> to vector<8x1xf32>
      %64 = vector.extract_strided_slice %15 {offsets = [5, 0], sizes = [1, 128], strides = [1, 1]} : vector<32x128xf32> to vector<1x128xf32>
      %65 = vector.broadcast %63 : vector<8x1xf32> to vector<8x128xf32>
      %66 = vector.broadcast %64 : vector<1x128xf32> to vector<8x128xf32>
      %67 = arith.subf %65, %66 : vector<8x128xf32>
      %68 = math.absf %67 : vector<8x128xf32>
      %69 = arith.addf %62, %68 : vector<8x128xf32>
      %70 = vector.extract_strided_slice %13 {offsets = [0, 6], sizes = [8, 1], strides = [1, 1]} : vector<8x32xf32> to vector<8x1xf32>
      %71 = vector.extract_strided_slice %15 {offsets = [6, 0], sizes = [1, 128], strides = [1, 1]} : vector<32x128xf32> to vector<1x128xf32>
      %72 = vector.broadcast %70 : vector<8x1xf32> to vector<8x128xf32>
      %73 = vector.broadcast %71 : vector<1x128xf32> to vector<8x128xf32>
      %74 = arith.subf %72, %73 : vector<8x128xf32>
      %75 = math.absf %74 : vector<8x128xf32>
      %76 = arith.addf %69, %75 : vector<8x128xf32>
      %77 = vector.extract_strided_slice %13 {offsets = [0, 7], sizes = [8, 1], strides = [1, 1]} : vector<8x32xf32> to vector<8x1xf32>
      %78 = vector.extract_strided_slice %15 {offsets = [7, 0], sizes = [1, 128], strides = [1, 1]} : vector<32x128xf32> to vector<1x128xf32>
      %79 = vector.broadcast %77 : vector<8x1xf32> to vector<8x128xf32>
      %80 = vector.broadcast %78 : vector<1x128xf32> to vector<8x128xf32>
      %81 = arith.subf %79, %80 : vector<8x128xf32>
      %82 = math.absf %81 : vector<8x128xf32>
      %83 = arith.addf %76, %82 : vector<8x128xf32>
      %84 = vector.extract_strided_slice %13 {offsets = [0, 8], sizes = [8, 1], strides = [1, 1]} : vector<8x32xf32> to vector<8x1xf32>
      %85 = vector.extract_strided_slice %15 {offsets = [8, 0], sizes = [1, 128], strides = [1, 1]} : vector<32x128xf32> to vector<1x128xf32>
      %86 = vector.broadcast %84 : vector<8x1xf32> to vector<8x128xf32>
      %87 = vector.broadcast %85 : vector<1x128xf32> to vector<8x128xf32>
      %88 = arith.subf %86, %87 : vector<8x128xf32>
      %89 = math.absf %88 : vector<8x128xf32>
      %90 = arith.addf %83, %89 : vector<8x128xf32>
      %91 = vector.extract_strided_slice %13 {offsets = [0, 9], sizes = [8, 1], strides = [1, 1]} : vector<8x32xf32> to vector<8x1xf32>
      %92 = vector.extract_strided_slice %15 {offsets = [9, 0], sizes = [1, 128], strides = [1, 1]} : vector<32x128xf32> to vector<1x128xf32>
      %93 = vector.broadcast %91 : vector<8x1xf32> to vector<8x128xf32>
      %94 = vector.broadcast %92 : vector<1x128xf32> to vector<8x128xf32>
      %95 = arith.subf %93, %94 : vector<8x128xf32>
      %96 = math.absf %95 : vector<8x128xf32>
      %97 = arith.addf %90, %96 : vector<8x128xf32>
      %98 = vector.extract_strided_slice %13 {offsets = [0, 10], sizes = [8, 1], strides = [1, 1]} : vector<8x32xf32> to vector<8x1xf32>
      %99 = vector.extract_strided_slice %15 {offsets = [10, 0], sizes = [1, 128], strides = [1, 1]} : vector<32x128xf32> to vector<1x128xf32>
      %100 = vector.broadcast %98 : vector<8x1xf32> to vector<8x128xf32>
      %101 = vector.broadcast %99 : vector<1x128xf32> to vector<8x128xf32>
      %102 = arith.subf %100, %101 : vector<8x128xf32>
      %103 = math.absf %102 : vector<8x128xf32>
      %104 = arith.addf %97, %103 : vector<8x128xf32>
      %105 = vector.extract_strided_slice %13 {offsets = [0, 11], sizes = [8, 1], strides = [1, 1]} : vector<8x32xf32> to vector<8x1xf32>
      %106 = vector.extract_strided_slice %15 {offsets = [11, 0], sizes = [1, 128], strides = [1, 1]} : vector<32x128xf32> to vector<1x128xf32>
      %107 = vector.broadcast %105 : vector<8x1xf32> to vector<8x128xf32>
      %108 = vector.broadcast %106 : vector<1x128xf32> to vector<8x128xf32>
      %109 = arith.subf %107, %108 : vector<8x128xf32>
      %110 = math.absf %109 : vector<8x128xf32>
      %111 = arith.addf %104, %110 : vector<8x128xf32>
      %112 = vector.extract_strided_slice %13 {offsets = [0, 12], sizes = [8, 1], strides = [1, 1]} : vector<8x32xf32> to vector<8x1xf32>
      %113 = vector.extract_strided_slice %15 {offsets = [12, 0], sizes = [1, 128], strides = [1, 1]} : vector<32x128xf32> to vector<1x128xf32>
      %114 = vector.broadcast %112 : vector<8x1xf32> to vector<8x128xf32>
      %115 = vector.broadcast %113 : vector<1x128xf32> to vector<8x128xf32>
      %116 = arith.subf %114, %115 : vector<8x128xf32>
      %117 = math.absf %116 : vector<8x128xf32>
      %118 = arith.addf %111, %117 : vector<8x128xf32>
      %119 = vector.extract_strided_slice %13 {offsets = [0, 13], sizes = [8, 1], strides = [1, 1]} : vector<8x32xf32> to vector<8x1xf32>
      %120 = vector.extract_strided_slice %15 {offsets = [13, 0], sizes = [1, 128], strides = [1, 1]} : vector<32x128xf32> to vector<1x128xf32>
      %121 = vector.broadcast %119 : vector<8x1xf32> to vector<8x128xf32>
      %122 = vector.broadcast %120 : vector<1x128xf32> to vector<8x128xf32>
      %123 = arith.subf %121, %122 : vector<8x128xf32>
      %124 = math.absf %123 : vector<8x128xf32>
      %125 = arith.addf %118, %124 : vector<8x128xf32>
      %126 = vector.extract_strided_slice %13 {offsets = [0, 14], sizes = [8, 1], strides = [1, 1]} : vector<8x32xf32> to vector<8x1xf32>
      %127 = vector.extract_strided_slice %15 {offsets = [14, 0], sizes = [1, 128], strides = [1, 1]} : vector<32x128xf32> to vector<1x128xf32>
      %128 = vector.broadcast %126 : vector<8x1xf32> to vector<8x128xf32>
      %129 = vector.broadcast %127 : vector<1x128xf32> to vector<8x128xf32>
      %130 = arith.subf %128, %129 : vector<8x128xf32>
      %131 = math.absf %130 : vector<8x128xf32>
      %132 = arith.addf %125, %131 : vector<8x128xf32>
      %133 = vector.extract_strided_slice %13 {offsets = [0, 15], sizes = [8, 1], strides = [1, 1]} : vector<8x32xf32> to vector<8x1xf32>
      %134 = vector.extract_strided_slice %15 {offsets = [15, 0], sizes = [1, 128], strides = [1, 1]} : vector<32x128xf32> to vector<1x128xf32>
      %135 = vector.broadcast %133 : vector<8x1xf32> to vector<8x128xf32>
      %136 = vector.broadcast %134 : vector<1x128xf32> to vector<8x128xf32>
      %137 = arith.subf %135, %136 : vector<8x128xf32>
      %138 = math.absf %137 : vector<8x128xf32>
      %139 = arith.addf %132, %138 : vector<8x128xf32>
      %140 = vector.extract_strided_slice %13 {offsets = [0, 16], sizes = [8, 1], strides = [1, 1]} : vector<8x32xf32> to vector<8x1xf32>
      %141 = vector.extract_strided_slice %15 {offsets = [16, 0], sizes = [1, 128], strides = [1, 1]} : vector<32x128xf32> to vector<1x128xf32>
      %142 = vector.broadcast %140 : vector<8x1xf32> to vector<8x128xf32>
      %143 = vector.broadcast %141 : vector<1x128xf32> to vector<8x128xf32>
      %144 = arith.subf %142, %143 : vector<8x128xf32>
      %145 = math.absf %144 : vector<8x128xf32>
      %146 = arith.addf %139, %145 : vector<8x128xf32>
      %147 = vector.extract_strided_slice %13 {offsets = [0, 17], sizes = [8, 1], strides = [1, 1]} : vector<8x32xf32> to vector<8x1xf32>
      %148 = vector.extract_strided_slice %15 {offsets = [17, 0], sizes = [1, 128], strides = [1, 1]} : vector<32x128xf32> to vector<1x128xf32>
      %149 = vector.broadcast %147 : vector<8x1xf32> to vector<8x128xf32>
      %150 = vector.broadcast %148 : vector<1x128xf32> to vector<8x128xf32>
      %151 = arith.subf %149, %150 : vector<8x128xf32>
      %152 = math.absf %151 : vector<8x128xf32>
      %153 = arith.addf %146, %152 : vector<8x128xf32>
      %154 = vector.extract_strided_slice %13 {offsets = [0, 18], sizes = [8, 1], strides = [1, 1]} : vector<8x32xf32> to vector<8x1xf32>
      %155 = vector.extract_strided_slice %15 {offsets = [18, 0], sizes = [1, 128], strides = [1, 1]} : vector<32x128xf32> to vector<1x128xf32>
      %156 = vector.broadcast %154 : vector<8x1xf32> to vector<8x128xf32>
      %157 = vector.broadcast %155 : vector<1x128xf32> to vector<8x128xf32>
      %158 = arith.subf %156, %157 : vector<8x128xf32>
      %159 = math.absf %158 : vector<8x128xf32>
      %160 = arith.addf %153, %159 : vector<8x128xf32>
      %161 = vector.extract_strided_slice %13 {offsets = [0, 19], sizes = [8, 1], strides = [1, 1]} : vector<8x32xf32> to vector<8x1xf32>
      %162 = vector.extract_strided_slice %15 {offsets = [19, 0], sizes = [1, 128], strides = [1, 1]} : vector<32x128xf32> to vector<1x128xf32>
      %163 = vector.broadcast %161 : vector<8x1xf32> to vector<8x128xf32>
      %164 = vector.broadcast %162 : vector<1x128xf32> to vector<8x128xf32>
      %165 = arith.subf %163, %164 : vector<8x128xf32>
      %166 = math.absf %165 : vector<8x128xf32>
      %167 = arith.addf %160, %166 : vector<8x128xf32>
      %168 = vector.extract_strided_slice %13 {offsets = [0, 20], sizes = [8, 1], strides = [1, 1]} : vector<8x32xf32> to vector<8x1xf32>
      %169 = vector.extract_strided_slice %15 {offsets = [20, 0], sizes = [1, 128], strides = [1, 1]} : vector<32x128xf32> to vector<1x128xf32>
      %170 = vector.broadcast %168 : vector<8x1xf32> to vector<8x128xf32>
      %171 = vector.broadcast %169 : vector<1x128xf32> to vector<8x128xf32>
      %172 = arith.subf %170, %171 : vector<8x128xf32>
      %173 = math.absf %172 : vector<8x128xf32>
      %174 = arith.addf %167, %173 : vector<8x128xf32>
      %175 = vector.extract_strided_slice %13 {offsets = [0, 21], sizes = [8, 1], strides = [1, 1]} : vector<8x32xf32> to vector<8x1xf32>
      %176 = vector.extract_strided_slice %15 {offsets = [21, 0], sizes = [1, 128], strides = [1, 1]} : vector<32x128xf32> to vector<1x128xf32>
      %177 = vector.broadcast %175 : vector<8x1xf32> to vector<8x128xf32>
      %178 = vector.broadcast %176 : vector<1x128xf32> to vector<8x128xf32>
      %179 = arith.subf %177, %178 : vector<8x128xf32>
      %180 = math.absf %179 : vector<8x128xf32>
      %181 = arith.addf %174, %180 : vector<8x128xf32>
      %182 = vector.extract_strided_slice %13 {offsets = [0, 22], sizes = [8, 1], strides = [1, 1]} : vector<8x32xf32> to vector<8x1xf32>
      %183 = vector.extract_strided_slice %15 {offsets = [22, 0], sizes = [1, 128], strides = [1, 1]} : vector<32x128xf32> to vector<1x128xf32>
      %184 = vector.broadcast %182 : vector<8x1xf32> to vector<8x128xf32>
      %185 = vector.broadcast %183 : vector<1x128xf32> to vector<8x128xf32>
      %186 = arith.subf %184, %185 : vector<8x128xf32>
      %187 = math.absf %186 : vector<8x128xf32>
      %188 = arith.addf %181, %187 : vector<8x128xf32>
      %189 = vector.extract_strided_slice %13 {offsets = [0, 23], sizes = [8, 1], strides = [1, 1]} : vector<8x32xf32> to vector<8x1xf32>
      %190 = vector.extract_strided_slice %15 {offsets = [23, 0], sizes = [1, 128], strides = [1, 1]} : vector<32x128xf32> to vector<1x128xf32>
      %191 = vector.broadcast %189 : vector<8x1xf32> to vector<8x128xf32>
      %192 = vector.broadcast %190 : vector<1x128xf32> to vector<8x128xf32>
      %193 = arith.subf %191, %192 : vector<8x128xf32>
      %194 = math.absf %193 : vector<8x128xf32>
      %195 = arith.addf %188, %194 : vector<8x128xf32>
      %196 = vector.extract_strided_slice %13 {offsets = [0, 24], sizes = [8, 1], strides = [1, 1]} : vector<8x32xf32> to vector<8x1xf32>
      %197 = vector.extract_strided_slice %15 {offsets = [24, 0], sizes = [1, 128], strides = [1, 1]} : vector<32x128xf32> to vector<1x128xf32>
      %198 = vector.broadcast %196 : vector<8x1xf32> to vector<8x128xf32>
      %199 = vector.broadcast %197 : vector<1x128xf32> to vector<8x128xf32>
      %200 = arith.subf %198, %199 : vector<8x128xf32>
      %201 = math.absf %200 : vector<8x128xf32>
      %202 = arith.addf %195, %201 : vector<8x128xf32>
      %203 = vector.extract_strided_slice %13 {offsets = [0, 25], sizes = [8, 1], strides = [1, 1]} : vector<8x32xf32> to vector<8x1xf32>
      %204 = vector.extract_strided_slice %15 {offsets = [25, 0], sizes = [1, 128], strides = [1, 1]} : vector<32x128xf32> to vector<1x128xf32>
      %205 = vector.broadcast %203 : vector<8x1xf32> to vector<8x128xf32>
      %206 = vector.broadcast %204 : vector<1x128xf32> to vector<8x128xf32>
      %207 = arith.subf %205, %206 : vector<8x128xf32>
      %208 = math.absf %207 : vector<8x128xf32>
      %209 = arith.addf %202, %208 : vector<8x128xf32>
      %210 = vector.extract_strided_slice %13 {offsets = [0, 26], sizes = [8, 1], strides = [1, 1]} : vector<8x32xf32> to vector<8x1xf32>
      %211 = vector.extract_strided_slice %15 {offsets = [26, 0], sizes = [1, 128], strides = [1, 1]} : vector<32x128xf32> to vector<1x128xf32>
      %212 = vector.broadcast %210 : vector<8x1xf32> to vector<8x128xf32>
      %213 = vector.broadcast %211 : vector<1x128xf32> to vector<8x128xf32>
      %214 = arith.subf %212, %213 : vector<8x128xf32>
      %215 = math.absf %214 : vector<8x128xf32>
      %216 = arith.addf %209, %215 : vector<8x128xf32>
      %217 = vector.extract_strided_slice %13 {offsets = [0, 27], sizes = [8, 1], strides = [1, 1]} : vector<8x32xf32> to vector<8x1xf32>
      %218 = vector.extract_strided_slice %15 {offsets = [27, 0], sizes = [1, 128], strides = [1, 1]} : vector<32x128xf32> to vector<1x128xf32>
      %219 = vector.broadcast %217 : vector<8x1xf32> to vector<8x128xf32>
      %220 = vector.broadcast %218 : vector<1x128xf32> to vector<8x128xf32>
      %221 = arith.subf %219, %220 : vector<8x128xf32>
      %222 = math.absf %221 : vector<8x128xf32>
      %223 = arith.addf %216, %222 : vector<8x128xf32>
      %224 = vector.extract_strided_slice %13 {offsets = [0, 28], sizes = [8, 1], strides = [1, 1]} : vector<8x32xf32> to vector<8x1xf32>
      %225 = vector.extract_strided_slice %15 {offsets = [28, 0], sizes = [1, 128], strides = [1, 1]} : vector<32x128xf32> to vector<1x128xf32>
      %226 = vector.broadcast %224 : vector<8x1xf32> to vector<8x128xf32>
      %227 = vector.broadcast %225 : vector<1x128xf32> to vector<8x128xf32>
      %228 = arith.subf %226, %227 : vector<8x128xf32>
      %229 = math.absf %228 : vector<8x128xf32>
      %230 = arith.addf %223, %229 : vector<8x128xf32>
      %231 = vector.extract_strided_slice %13 {offsets = [0, 29], sizes = [8, 1], strides = [1, 1]} : vector<8x32xf32> to vector<8x1xf32>
      %232 = vector.extract_strided_slice %15 {offsets = [29, 0], sizes = [1, 128], strides = [1, 1]} : vector<32x128xf32> to vector<1x128xf32>
      %233 = vector.broadcast %231 : vector<8x1xf32> to vector<8x128xf32>
      %234 = vector.broadcast %232 : vector<1x128xf32> to vector<8x128xf32>
      %235 = arith.subf %233, %234 : vector<8x128xf32>
      %236 = math.absf %235 : vector<8x128xf32>
      %237 = arith.addf %230, %236 : vector<8x128xf32>
      %238 = vector.extract_strided_slice %13 {offsets = [0, 30], sizes = [8, 1], strides = [1, 1]} : vector<8x32xf32> to vector<8x1xf32>
      %239 = vector.extract_strided_slice %15 {offsets = [30, 0], sizes = [1, 128], strides = [1, 1]} : vector<32x128xf32> to vector<1x128xf32>
      %240 = vector.broadcast %238 : vector<8x1xf32> to vector<8x128xf32>
      %241 = vector.broadcast %239 : vector<1x128xf32> to vector<8x128xf32>
      %242 = arith.subf %240, %241 : vector<8x128xf32>
      %243 = math.absf %242 : vector<8x128xf32>
      %244 = arith.addf %237, %243 : vector<8x128xf32>
      %245 = vector.extract_strided_slice %13 {offsets = [0, 31], sizes = [8, 1], strides = [1, 1]} : vector<8x32xf32> to vector<8x1xf32>
      %246 = vector.extract_strided_slice %15 {offsets = [31, 0], sizes = [1, 128], strides = [1, 1]} : vector<32x128xf32> to vector<1x128xf32>
      %247 = vector.broadcast %245 : vector<8x1xf32> to vector<8x128xf32>
      %248 = vector.broadcast %246 : vector<1x128xf32> to vector<8x128xf32>
      %249 = arith.subf %247, %248 : vector<8x128xf32>
      %250 = math.absf %249 : vector<8x128xf32>
      %251 = arith.addf %244, %250 : vector<8x128xf32>
      %cst = arith.constant 1.000000e+32 : f32
      %252 = vector.broadcast %cst : f32 to vector<8x128xf32>
      %253 = arith.select %28, %251, %252 : vector<8x128xi1>, vector<8x128xf32>
      %c0_10 = arith.constant 0 : index
      %c0_11 = arith.constant 0 : index
      %c0_12 = arith.constant 0 : index
      %254 = vector.load %arg5[%c0_10, %c0_11, %c0_12] : memref<1x8x128xf32, #tpu.memory_space<vmem>>, vector<1x8x128xf32>
      %255 = vector.shape_cast %254 : vector<1x8x128xf32> to vector<8x128xf32>
      %256 = vector.shape_cast %253 : vector<8x128xf32> to vector<1x8x128xf32>
      tpu.vector_store %arg5[%c0_10, %c0_11, %c0_12], %256 {strides = array<i32>} : memref<1x8x128xf32, #tpu.memory_space<vmem>>, vector<1x8x128xf32>,
    } else {
    }
    %true = arith.constant true
    %9 = arith.xori %6, %true : i1
    %10 = arith.extui %9 : i1 to i32
    %c0_i32_2 = arith.constant 0 : i32
    %11 = arith.cmpi ne, %10, %c0_i32_2 : i32
    scf.if %11 {
      %cst = arith.constant 1.000000e+32 : f32
      %12 = vector.broadcast %cst : f32 to vector<1x8x128xf32>
      %c0 = arith.constant 0 : index
      %c0_3 = arith.constant 0 : index
      %c0_4 = arith.constant 0 : index
      %13 = vector.load %arg5[%c0, %c0_3, %c0_4] : memref<1x8x128xf32, #tpu.memory_space<vmem>>, vector<1x8x128xf32>
      tpu.vector_store %arg5[%c0, %c0_3, %c0_4], %12 {strides = array<i32>} : memref<1x8x128xf32, #tpu.memory_space<vmem>>, vector<1x8x128xf32>,
    } else {
    }
    return
  }
  func.func @transform_0(%arg0: i32, %arg1: memref<2xi32, #tpu.memory_space<smem>>, %arg2: memref<2xi32, #tpu.memory_space<smem>>) -> (i32, i32, i32) {
    %c0_i32 = arith.constant 0 : i32
    %c0_i32_0 = arith.constant 0 : i32
    %c0_i32_1 = arith.constant 0 : i32
    return %arg0, %c0_i32, %c0_i32_0 : i32, i32, i32
  }
  func.func @transform_1(%arg0: i32, %arg1: memref<2xi32, #tpu.memory_space<smem>>, %arg2: memref<2xi32, #tpu.memory_space<smem>>) -> (i32, i32, i32) {
    %c0_i32 = arith.constant 0 : i32
    %c0_i32_0 = arith.constant 0 : i32
    %c0_i32_1 = arith.constant 0 : i32
    return %arg0, %c0_i32, %c0_i32_0 : i32, i32, i32
  }
  func.func @transform_2(%arg0: i32, %arg1: memref<2xi32, #tpu.memory_space<smem>>, %arg2: memref<2xi32, #tpu.memory_space<smem>>) -> (i32, i32, i32) {
    %c0_i32 = arith.constant 0 : i32
    %c0_i32_0 = arith.constant 0 : i32
    %c0_i32_1 = arith.constant 0 : i32
    return %arg0, %c0_i32, %c0_i32_0 : i32, i32, i32
  }
}

</mosaic_0001>

<bundles_post_ra>
// kernel: tpu_custom_call.1
= control target key start
LH: loop header
LB: loop body
LE: loop exit
PB: predicated region body
PF: predicated region fallthrough
CT: control target
= control target key end

     0   :  { %s1404_s0 = inlined_call_operand.hbm [shape: s32[2], index: 0, kind: input, shape index: {}]   ;;  %s1405_s2 = inlined_call_operand.hbm [shape: f32[2,8,32], index: 2, kind: input, shape index: {}]   ;;  %s1406_s3 = inlined_call_operand.hbm [shape: f32[2,32,128], index: 3, kind: input, shape index: {}]   ;;  %s1407_s4 = inlined_call_operand.hbm [shape: f32[2,8,128], index: 4, kind: output, shape index: {}]   ;;  %s1408_s1 = inlined_call_operand.vmem [shape: s32[2], index: 1, kind: input, shape index: {}]  }
   0x1   :  { %s838_s17 = scalar_lea.hbm %s1404_s0, 16 }
   0x2   :  { %p839_p0 = scmp.ne.s32.totalorder %s1404_s0, %s838_s17  ;;  %p842_p1 = scmp.lt.u32.totalorder %s838_s17, %s1404_s0 }
   0x4   :  { %p844_p2 = pnand %p842_p1, %p839_p0 }
   0x6   :  { %847 = shalt.err (!%p844_p2)  }
   0x7   :  { %s994_s22 = smov [#allocation3]   ;;  %s11_s27 = sshll.u32 %s1408_s1, 4  ;;  %s12_s27 = int_to_ptr.vmem [resolvable:$true] %s11_s27 }
   0x8   :  { %10 = dma.hbm_to_smem %s1404_s0, 16, %s994_s22, [#allocation2] }
   0x9   :  { %s848_s28 = scalar_lea.vmem %s12_s27, 16  ;;  %p853_p4 = scmp.lt.s32.totalorder %s12_s27, %s12_s27 }
   0xa   :  { %p849_p3 = scmp.ne.s32.totalorder %s12_s27, %s848_s28  ;;  %p854_p5 = scmp.lt.s32.totalorder %s848_s28, %s848_s28 }
   0xc   :  { %p855_p6 = por %p854_p5, %p853_p4 }
   0xe   :  { %p856_p7 = pnand %p855_p6, %p849_p3 }
  0x10   :  { %859 = shalt.err (!%p856_p7)  }
  0x11   :  { %s995_s29 = smov [#allocation4]  }
  0x12   :  { %14 = dma.vmem_to_smem %s12_s27, 16, %s995_s29, [#allocation2] }
  0x13   :  { %964 = dma.done.wait [#allocation2], 32 }
  0x14   :  { %965 = vsyncadd [#allocation2], 4294967264 }
  0x15   :  { %16 = sfence }
  0x16   :  { %17 = vsyncpa [#allocation6], 0 }
  0x17   :  { %19 = vsyncpa [#allocation6 + $0x1], 0 }
  0x18   :  { %20 = vsyncpa [#allocation9], 0 }
  0x19   :  { %22 = vsyncpa [#allocation9 + $0x1], 0 }
  0x1a   :  { %23 = vsyncpa [#allocation7], 0 }
  0x1b   :  { %25 = vsyncpa [#allocation7 + $0x1], 0  ;;  %s1074_s0 = smov 0   ;;  %s1076_s1 = smov 0  }
  0x1c   :  { %s1078_s30 = smov 0   ;;  %s1080_s5 = smov 0  }
  0x1d LB: > { %s1095_s6 = sadd.s32 4294967295, %s992_s5   ;;  %s700_s7 = sadd.s32 4294967294, %s992_s5   ;;  %s992_s5 = sphi %s1080_s5, %s1427_s5   ;;  %s988_s30 = sphi %s1078_s30, %s1426_s30   ;;  %s984_s1 = sphi %s1076_s1, %s1425_s1   ;;  %s980_s0 = sphi %s1074_s0, %s1424_s0  }
  0x1e   : > { %s1099_s8 = sadd.s32 1, %s992_s5   ;;  %s38_s9 = sadd.s32 1, %s988_s30 }
  0x1f   : > { %s35_s10 = ssub.s32 %s992_s5, %s1099_s8  ;;  %p45_p8 = scmp.ne.s32.totalorder %s988_s30, %s984_s1 }
  0x20   : > { %p36_p9 = scmp.eq.s32.totalorder %s35_s10, 0  ;;  %p46_p10 = scmp.eq.s32.totalorder %s992_s5, 0 }
  0x21   : > { %p51_p11 = scmp.ne.s32.totalorder %s984_s1, %s980_s0  ;;  %p52_p12 = scmp.eq.s32.totalorder %s1095_s6, 0 }
  0x22   : > { %s1111_s11 = scalar_select %p36_p9, %s988_s30, %s38_s9  }
  0x23   : > { %p1113_p13 = por %p46_p10, %p45_p8  ;;  %p1117_p0 = por %p52_p12, %p51_p11 }
  0x24   : > { %p101_p1 = scmp.eq.s32.totalorder %s1095_s6, 1  ;;  %p107_p2 = scmp.eq.s32.totalorder %s700_s7, 1 }
  0x25   : > { %s1412_s13 = scalar_select %p1117_p0, 1, 0 }
  0x26   : > { %p734_p4 = scmp.lt.s32.totalorder %s992_s5, 2  ;;  %p1124_p5 = por %p101_p1, %p45_p8 }
  0x27   : > { %p1128_p6 = por %p107_p2, %p51_p11  ;;  %s1133_s16 = sand.u32 1, %s988_s30  }
  0x28   : > { %s1413_s14 = scalar_select %p1124_p5, 1, 0 }
  0x29   : > { %s1414_s15 = scalar_select %p1128_p6, 1, 0 }
  0x2a   : > { %s704_s17 = sshll.u32 %s992_s5, 7  ;;  %s703_s18 = sshll.u32 %s1133_s16, 3 }
  0x2b   : > { %s1140_s21 = scalar_lea.hbm %s1405_s2, %s704_s17  ;;  %s131_s22 = scalar_lea.vmem [#allocation5], %s703_s18 }
  0x2c   : > { %s138_s23 = sshll.u32 %s131_s22, 4  ;;  %p1144_p7 = pnand %p734_p4, %p1113_p13  ;;  %s1148_s23 = int_to_ptr.vmem [resolvable:$true] %s138_s23 }
  0x2d   : > { %s128_s25 = scalar_lea.sflag [#allocation6], %s1133_s16  ;;  %s860_s26 = scalar_lea.hbm %s1140_s21, 128 }
  0x2e   : > { %p861_p10 = scmp.ne.s32.totalorder %s1140_s21, %s860_s26  ;;  %p862_p11 = pneg %p1144_p7 }
  0x2f   : > { %s865_s29 = scalar_lea.hbm %s1405_s2, 256  ;;  %p866_p13 = scmp.lt.u32.totalorder %s1140_s21, %s1405_s2 }
  0x30   : > { %p863_p12 = pnand %p862_p11, %p861_p10  ;;  %p867_p2 = scmp.lt.u32.totalorder %s865_s29, %s860_s26 }
  0x31   : > { %p869_p3 = scmp.lt.u32.totalorder %s860_s26, %s1140_s21 }
  0x32   : > { %p864_p1 = pneg %p863_p12  ;;  %p868_p4 = por %p867_p2, %p866_p13 }
  0x34   : > { %p870_p8 = por %p869_p3, %p868_p4 }
  0x36   : > { %p871_p9 = pnand %p870_p8, %p864_p1 }
  0x38   : > { %874 = shalt.err (!%p871_p9)
}
  0x39   : > { %s875_s10 = scalar_lea.vmem %s1148_s23, 128  ;;  %s996_s12 = smov [#allocation5]  }
  0x3a   : > { %p876_p10 = scmp.ne.s32.totalorder %s1148_s23, %s875_s10  ;;  %s880_s17 = sshll.u32 %s996_s12, 4  ;;  %s881_s17 = int_to_ptr.vmem [resolvable:$false] %s880_s17 }
  0x3b   : > { %s882_s18 = scalar_lea.vmem %s881_s17, 256  ;;  %p883_p5 = scmp.lt.s32.totalorder %s1148_s23, %s881_s17 }
  0x3c   : > { %p878_p12 = pnand %p876_p10, %p862_p11  ;;  %p884_p13 = scmp.lt.s32.totalorder %s882_s18, %s875_s10 }
  0x3e   : > { %p879_p6 = pneg %p878_p12  ;;  %p885_p2 = por %p884_p13, %p883_p5 }
  0x40   : > { %p886_p3 = pnand %p885_p2, %p879_p6 }
  0x42   : > { %889 = shalt.err (!%p886_p3)
}
  0x43   : > { %726 = dma.hbm_to_vmem [thread:$0]  (!%p1144_p7), %s1140_s21, 128, %s1148_s23, %s128_s25  }
  0x44   : > { %p1416_p8 = scmp.lt.s32.totalorder %s992_s5, 3  ;;  %p1417_p9 = scmp.ge.s32.totalorder %s992_s5, 1 }
  0x45   : > { %s705_s20 = sshll.u32 %s1133_s16, 5  ;;  %s716_s22 = sshll.u32 %s992_s5, 9 }
  0x46   : > { %p1182_p1 = pnand %p1417_p9, %p1416_p8  ;;  %s1191_s28 = scalar_lea.hbm %s1406_s3, %s716_s22 }
  0x47   : > { %s149_s29 = scalar_lea.vmem [#allocation8], %s705_s20  ;;  %s146_s21 = scalar_lea.sflag [#allocation9], %s1133_s16 }
  0x48   : > { %s156_s7 = sshll.u32 %s149_s29, 4  ;;  %s890_s23 = scalar_lea.hbm %s1191_s28, 512  ;;  %s1193_s7 = int_to_ptr.vmem [resolvable:$true] %s156_s7 }
  0x49   : > { %p891_p5 = scmp.ne.s32.totalorder %s1191_s28, %s890_s23  ;;  %s895_s10 = scalar_lea.hbm %s1406_s3, 1024 }
  0x4a   : > { %p896_p10 = scmp.lt.u32.totalorder %s1191_s28, %s1406_s3  ;;  %p897_p12 = scmp.lt.u32.totalorder %s895_s10, %s890_s23 }
  0x4b   : > { %p893_p6 = pnand %p891_p5, %p862_p11  ;;  %p899_p2 = scmp.lt.u32.totalorder %s890_s23, %s1191_s28 }
  0x4c   : > { %p898_p13 = por %p897_p12, %p896_p10 }
  0x4d   : > { %p894_p4 = pneg %p893_p6 }
  0x4e   : > { %p900_p3 = por %p899_p2, %p898_p13 }
  0x50   : > { %p901_p8 = pnand %p900_p3, %p894_p4 }
  0x52   : > { %904 = shalt.err (!%p901_p8)
}
  0x53   : > { %s905_s18 = scalar_lea.vmem %s1193_s7, 512  ;;  %s997_s20 = smov [#allocation8]  }
  0x54   : > { %p906_p9 = scmp.ne.s32.totalorder %s1193_s7, %s905_s18  ;;  %s910_s22 = sshll.u32 %s997_s20, 4  ;;  %s911_s22 = int_to_ptr.vmem [resolvable:$false] %s910_s22 }
  0x55   : > { %s912_s26 = scalar_lea.vmem %s911_s22, 1024  ;;  %p913_p0 = scmp.lt.s32.totalorder %s1193_s7, %s911_s22 }
  0x56   : > { %p908_p5 = pnand %p906_p9, %p862_p11  ;;  %p914_p10 = scmp.lt.s32.totalorder %s912_s26, %s905_s18 }
  0x58   : > { %p909_p6 = pneg %p908_p5  ;;  %p915_p12 = por %p914_p10, %p913_p0 }
  0x5a   : > { %p916_p13 = pnand %p915_p12, %p909_p6 }
  0x5c   : > { %919 = shalt.err (!%p916_p13)
}
  0x5d   : > { %s998_s27 = smov 128   ;;  %s999_s29 = smov 8  }
  0x5e   : > { %729 = dma.hbm_to_vmem [thread:$0]  (!%p1144_p7), %s1191_s28, 512, %s1193_s7, %s146_s21, %s998_s27, %s998_s27, %s999_s29  }
  0x5f   : > { %168 = sbr.rel (%p1182_p1) target bundleno = 386 (0x182), region = 28  ;;  %s1224_s23 = sand.u32 (!%p1182_p1), 1, %s984_s1  }
  0x60   : > { %s709_s25 = sshll.u32 (!%p1182_p1), %s1224_s23, 3  ;;  %s171_s9 = scalar_lea.sflag (!%p1182_p1), [#allocation6], %s1224_s23 }
  0x61   : > { %s174_s10 = scalar_lea.vmem (!%p1182_p1), [#allocation5], %s709_s25  ;;  %p1419_p0 = scmp.ne.s32.totalorder (!%p1182_p1), %s1412_s13, 0 }
  0x66   : > { %967 = dma.done.wait (%p1419_p0), %s171_s9, 128  }
  0x67   : > { %969 = vsyncadd (%p1419_p0), %s171_s9, 4294967168  ;;  %s710_s16 = sshll.u32 %s1224_s23, 5  ;;  %s180_s24 = scalar_lea.sflag [#allocation9], %s1224_s23 }
  0x68   : > { %s1234_s19 = scalar_lea.vmem [#allocation8], %s710_s16 }
  0x69   : > { %971 = dma.done.wait (%p1419_p0), %s180_s24, 512  }
  0x6a   : > { %973 = vsyncadd (%p1419_p0), %s180_s24, 4294966784  ;;  %s1241_s28 = sld [smem:[#allocation3 + %s1095_s6]]  ;;  %s1252_s12 = scalar_lea.vmem [#allocation10], %s709_s25 }
  0x6b   : > { %s1244_s7 = sld [smem:[#allocation4 + %s1095_s6]] }
  0x70   : > { %p211_p7 = scmp.gt.s32.totalorder %s1241_s28, 0 }
  0x71   : > { %p212_p11 = scmp.gt.s32.totalorder %s1244_s7, 0 }
  0x73   : > { %p1248_p1 = pnand %p212_p11, %p211_p7 }
  0x74   : > { %v1256_v0 = vld [vmem:[%s174_s10] sm:$0xff] (!%p1248_p1)  ;;  %v1000_v1 = vmov (!%p1248_p1), 2   ;;  %v1001_v2 = vmov (!%p1248_p1), 0   ;;  %v1002_v3 = vmov (!%p1248_p1), 3   ;;  %v1003_v4 = vmov (!%p1248_p1), 1   ;;  %v218_v36 = vld [vmem:[%s1234_s19] sm:$0xff] (!%p1248_p1) }
  0x75   : > { %216 = sbr.rel (%p1248_p1) target bundleno = 354 (0x162), region = 40  ;;  %807 = vset.pattern.permute.xlu1 (!%p1248_p1), %v1000_v1  ;;  %805 = vset.pattern.permute.xlu0 (!%p1248_p1), %v1001_v2  ;;  %v1004_v5 = vmov (!%p1248_p1), 4   ;;  %v1005_v6 = vmov (!%p1248_p1), 5   ;;  %v1006_v7 = vmov (!%p1248_p1), 6   ;;  %v1007_v8 = vmov (!%p1248_p1), 8  }
  0x76   : > { %258 = vperm.xlu1 (!%p1248_p1), %807, %v1256_v0   ;;  %237 = vperm.xlu0 (!%p1248_p1), %805, %v1256_v0   ;;  %v1008_v9 = vmov (!%p1248_p1), 7   ;;  %v1009_v10 = vmov (!%p1248_p1), 11   ;;  %v1010_v11 = vmov (!%p1248_p1), 9   ;;  %v1011_v12 = vmov (!%p1248_p1), 14  }
  0x77   : > { %v1012_v13 = vmov (!%p1248_p1), 10   ;;  %v1013_v14 = vmov (!%p1248_p1), 17   ;;  %v1014_v15 = vmov (!%p1248_p1), 12   ;;  %v1015_v16 = vmov (!%p1248_p1), 20  }
  0x78   : > { %v1016_v17 = vmov (!%p1248_p1), 13   ;;  %v1017_v18 = vmov (!%p1248_p1), 23   ;;  %v1018_v19 = vmov (!%p1248_p1), 15   ;;  %v1019_v20 = vmov (!%p1248_p1), 26  }
  0x79   : > { %v1020_v21 = vmov (!%p1248_p1), 16   ;;  %v1021_v22 = vmov (!%p1248_p1), 29   ;;  %v1022_v23 = vmov (!%p1248_p1), 18   ;;  %v1023_v24 = vmov (!%p1248_p1), 31  }
  0x7a   : > { %808 = vset.pattern.permute.xlu1 (!%p1248_p1), %v1002_v3  ;;  %806 = vset.pattern.permute.xlu0 (!%p1248_p1), %v1003_v4  ;;  %v1024_v25 = vmov (!%p1248_p1), 19   ;;  %v1025_v26 = vmov (!%p1248_p1), 21   ;;  %v1026_v27 = vmov (!%p1248_p1), 22   ;;  %v1027_v28 = vmov (!%p1248_p1), 24  }
  0x7b   : > { %269 = vperm.xlu1 (!%p1248_p1), %808, %v1256_v0   ;;  %247 = vperm.xlu0 (!%p1248_p1), %806, %v1256_v0   ;;  %v1028_v29 = vmov (!%p1248_p1), 25   ;;  %v1029_v30 = vmov (!%p1248_p1), 27   ;;  %v1030_v31 = vmov (!%p1248_p1), 28   ;;  %v1031_v32 = vmov (!%p1248_p1), 30  }
  0x7c   : > { %v222_v33 = vlaneseq }
  0x7e   : > { %v1291_v34 = vshrl.u32 %v222_v33, 7 }
  0x7f   : > { %809 = vset.pattern.permute.xlu1 %v1004_v5  ;;  %810 = vset.pattern.permute.xlu0 %v1005_v6 }
  0x80   : > { %280 = vperm.xlu1 %809, %v1256_v0   ;;  %291 = vperm.xlu0 %810, %v1256_v0   ;;  %v1294_v35 = vsub.s32 0, %v1291_v34  ;;  %v1298_v37 = vsub.s32 2, %v1291_v34  ;;  %v1302_v39 = vsub.s32 1, %v1291_v34  ;;  %v1305_v42 = vsub.s32 3, %v1291_v34 }
  0x81   : > { %v1310_v46 = vsub.s32 4, %v1291_v34  ;;  %v1313_v47 = vsub.s32 5, %v1291_v34  ;;  %v1319_v58 = vsub.s32 6, %v1291_v34  ;;  %v1323_v5 = vsub.s32 7, %v1291_v34 }
  0x82   : > { %v243_v38 = vrot.slane %v218_v36, %v1294_v35  ;;  %v264_v43 = vrot.slane %v218_v36, %v1298_v37  ;;  %v253_v45 = vrot.slane %v218_v36, %v1302_v39  ;;  %v275_v48 = vrot.slane %v218_v36, %v1305_v42 }
  0x83   : > { %v286_v54 = vrot.slane %v218_v36, %v1310_v46  ;;  %v297_v55 = vrot.slane %v218_v36, %v1313_v47  ;;  %v308_v3 = vrot.slane %v218_v36, %v1319_v58 }
  0x84   : > { %811 = vset.pattern.permute.xlu1 %v1006_v7  ;;  %813 = vset.pattern.permute.xlu0 %v1007_v8  ;;  %v219_v7 = vld [vmem:[%s1234_s19 + $0x8] sm:$0xff] }
  0x85   : > { %302 = vperm.xlu1 %811, %v1256_v0   ;;  %324 = vperm.xlu0 %813, %v1256_v0  }
  0x89   : > { %812 = vset.pattern.permute.xlu1 %v1008_v9  ;;  %816 = vset.pattern.permute.xlu0 %v1009_v10 }
  0x8a   : > { %313 = vperm.xlu1 %812, %v1256_v0   ;;  %357 = vperm.xlu0 %816, %v1256_v0  }
  0x8e   : > { %814 = vset.pattern.permute.xlu1 %v1010_v11  ;;  %819 = vset.pattern.permute.xlu0 %v1011_v12  ;;  %v319_v12 = vrot.slane %v218_v36, %v1323_v5 }
  0x8f   : > { %335 = vperm.xlu1 %814, %v1256_v0   ;;  %390 = vperm.xlu0 %819, %v1256_v0  }
  0x93   : > { %815 = vset.pattern.permute.xlu1 %v1012_v13  ;;  %822 = vset.pattern.permute.xlu0 %v1013_v14  ;;  %v330_v13 = vrot.slane %v219_v7, %v1294_v35 }
  0x94   : > { %346 = vperm.xlu1 %815, %v1256_v0   ;;  %423 = vperm.xlu0 %822, %v1256_v0  }
  0x98   : > { %817 = vset.pattern.permute.xlu1 %v1014_v15  ;;  %825 = vset.pattern.permute.xlu0 %v1015_v16 }
  0x99   : > { %368 = vperm.xlu1 %817, %v1256_v0   ;;  %456 = vperm.xlu0 %825, %v1256_v0  }
  0x9d   : > { %818 = vset.pattern.permute.xlu1 %v1016_v17  ;;  %828 = vset.pattern.permute.xlu0 %v1017_v18 }
  0x9e   : > { %379 = vperm.xlu1 %818, %v1256_v0   ;;  %489 = vperm.xlu0 %828, %v1256_v0  }
  0xa2   : > { %820 = vset.pattern.permute.xlu1 %v1018_v19  ;;  %831 = vset.pattern.permute.xlu0 %v1019_v20  ;;  %v341_v20 = vrot.slane %v219_v7, %v1302_v39 }
  0xa3   : > { %401 = vperm.xlu1 %820, %v1256_v0   ;;  %522 = vperm.xlu0 %831, %v1256_v0  }
  0xa7   : > { %821 = vset.pattern.permute.xlu1 %v1020_v21  ;;  %834 = vset.pattern.permute.xlu0 %v1021_v22 }
  0xa8   : > { %412 = vperm.xlu1 %821, %v1256_v0   ;;  %555 = vperm.xlu0 %834, %v1256_v0  }
  0xac   : > { %823 = vset.pattern.permute.xlu1 %v1022_v23  ;;  %837 = vset.pattern.permute.xlu0 %v1023_v24 }
  0xad   : > { %434 = vperm.xlu1 %823, %v1256_v0  }
  0xb1   : > { %824 = vset.pattern.permute.xlu1 %v1024_v25 }
  0xb2   : > { %445 = vperm.xlu1 %824, %v1256_v0  }
  0xb6   : > { %826 = vset.pattern.permute.xlu1 %v1025_v26 }
  0xb7   : > { %467 = vperm.xlu1 %826, %v1256_v0  }
  0xbb   : > { %827 = vset.pattern.permute.xlu1 %v1026_v27  ;;  %v352_v27 = vrot.slane %v219_v7, %v1298_v37 }
  0xbc   : > { %478 = vperm.xlu1 %827, %v1256_v0  }
  0xc0   : > { %829 = vset.pattern.permute.xlu1 %v1027_v28  ;;  %v363_v28 = vrot.slane %v219_v7, %v1305_v42 }
  0xc1   : > { %500 = vperm.xlu1 %829, %v1256_v0  }
  0xc5   : > { %830 = vset.pattern.permute.xlu1 %v1028_v29 }
  0xc6   : > { %511 = vperm.xlu1 %830, %v1256_v0  }
  0xca   : > { %832 = vset.pattern.permute.xlu1 %v1029_v30 }
  0xcb   : > { %533 = vperm.xlu1 %832, %v1256_v0  }
  0xcf   : > { %833 = vset.pattern.permute.xlu1 %v1030_v31 }
  0xd0   : > { %544 = vperm.xlu1 %833, %v1256_v0  }
  0xd4   : > { %835 = vset.pattern.permute.xlu1 %v1031_v32 }
  0xd5   : > { %566 = vperm.xlu1 %835, %v1256_v0  }
  0xd9   : > { %836 = vset.pattern.permute.xlu1 %v1023_v24 }
  0xda   : > { %577 = vperm.xlu1 %836, %v1256_v0  }
  0xf5   : > { %v259_v40 = vpop.permute.xlu1 %258  ;;  %v238_v41 = vpop.permute.xlu0 %237 }
  0xf6   : > { %v244_v44 = vsub.f32 %v238_v41, %v243_v38  ;;  %v265_v51 = vsub.f32 %v259_v40, %v264_v43  ;;  %v374_v40 = vrot.slane %v219_v7, %v1310_v46 }
  0xf8   : > { %v245_v52 = vand.u32 2147483647, %v244_v44  ;;  %v266_v59 = vand.u32 2147483647, %v265_v51  ;;  %v396_v51 = vrot.slane %v219_v7, %v1319_v58 }
  0xfa   : > { %v270_v49 = vpop.permute.xlu1 %269  ;;  %v248_v50 = vpop.permute.xlu0 %247 }
  0xfb   : > { %v254_v53 = vsub.f32 %v248_v50, %v253_v45  ;;  %v276_v56 = vsub.f32 %v270_v49, %v275_v48  ;;  %v385_v50 = vrot.slane %v219_v7, %v1313_v47 }
  0xfd   : > { %v255_v57 = vand.u32 2147483647, %v254_v53  ;;  %v277_v1 = vand.u32 2147483647, %v276_v56 }
  0xff   : > { %v256_v60 = vadd.f32 %v255_v57, %v245_v52  ;;  %v281_v61 = vpop.permute.xlu1 %280  ;;  %v292_v62 = vpop.permute.xlu0 %291 }
 0x100   : > { %v287_v63 = vsub.f32 %v281_v61, %v286_v54  ;;  %v298_v0 = vsub.f32 %v292_v62, %v297_v55  ;;  %v220_v62 = vld [vmem:[%s1234_s19 + $0x10] sm:$0xff] }
 0x101   : > { %v267_v2 = vadd.f32 %v266_v59, %v256_v60  ;;  %v407_v59 = vrot.slane %v219_v7, %v1323_v5 }
 0x102   : > { %v288_v4 = vand.u32 2147483647, %v287_v63  ;;  %v299_v8 = vand.u32 2147483647, %v298_v0 }
 0x103   : > { %v278_v6 = vadd.f32 %v277_v1, %v267_v2 }
 0x104   : > { %v303_v9 = vpop.permute.xlu1 %302  ;;  %v325_v14 = vpop.permute.xlu0 %324 }
 0x105   : > { %v289_v10 = vadd.f32 %v288_v4, %v278_v6  ;;  %v309_v11 = vsub.f32 %v303_v9, %v308_v3  ;;  %v331_v19 = vsub.f32 %v325_v14, %v330_v13  ;;  %v418_v3 = vrot.slane %v220_v62, %v1294_v35 }
 0x106   : > { %v429_v4 = vrot.slane %v220_v62, %v1302_v39  ;;  %v440_v13 = vrot.slane %v220_v62, %v1298_v37 }
 0x107   : > { %v300_v15 = vadd.f32 %v299_v8, %v289_v10  ;;  %v310_v16 = vand.u32 2147483647, %v309_v11  ;;  %v332_v24 = vand.u32 2147483647, %v331_v19  ;;  %v451_v19 = vrot.slane %v220_v62, %v1305_v42 }
 0x109   : > { %v314_v17 = vpop.permute.xlu1 %313  ;;  %v311_v21 = vadd.f32 %v310_v16, %v300_v15  ;;  %v358_v29 = vpop.permute.xlu0 %357 }
 0x10a   : > { %v320_v18 = vsub.f32 %v314_v17, %v319_v12  ;;  %v364_v38 = vsub.f32 %v358_v29, %v363_v28 }
 0x10c   : > { %v321_v22 = vand.u32 2147483647, %v320_v18  ;;  %v365_v45 = vand.u32 2147483647, %v364_v38  ;;  %v484_v38 = vrot.slane %v220_v62, %v1319_v58 }
 0x10e   : > { %v322_v23 = vadd.f32 %v321_v22, %v311_v21  ;;  %v336_v25 = vpop.permute.xlu1 %335  ;;  %v391_v52 = vpop.permute.xlu0 %390 }
 0x10f   : > { %v342_v26 = vsub.f32 %v336_v25, %v341_v20  ;;  %v397_v57 = vsub.f32 %v391_v52, %v396_v51  ;;  %v462_v20 = vrot.slane %v220_v62, %v1310_v46 }
 0x110   : > { %v333_v30 = vadd.f32 %v332_v24, %v322_v23 }
 0x111   : > { %v343_v31 = vand.u32 2147483647, %v342_v26  ;;  %v398_v0 = vand.u32 2147483647, %v397_v57 }
 0x113   : > { %v347_v32 = vpop.permute.xlu1 %346  ;;  %v344_v41 = vadd.f32 %v343_v31, %v333_v30  ;;  %v424_v6 = vpop.permute.xlu0 %423 }
 0x114   : > { %v353_v36 = vsub.f32 %v347_v32, %v352_v27  ;;  %v430_v12 = vsub.f32 %v424_v6, %v429_v4  ;;  %v473_v27 = vrot.slane %v220_v62, %v1313_v47 }
 0x116   : > { %v354_v43 = vand.u32 2147483647, %v353_v36  ;;  %v431_v16 = vand.u32 2147483647, %v430_v12 }
 0x118   : > { %v355_v44 = vadd.f32 %v354_v43, %v344_v41  ;;  %v369_v48 = vpop.permute.xlu1 %368  ;;  %v457_v21 = vpop.permute.xlu0 %456 }
 0x119   : > { %v375_v49 = vsub.f32 %v369_v48, %v374_v40  ;;  %v463_v26 = vsub.f32 %v457_v21, %v462_v20  ;;  %v495_v40 = vrot.slane %v220_v62, %v1323_v5 }
 0x11a   : > { %v366_v53 = vadd.f32 %v365_v45, %v355_v44  ;;  %v221_v45 = vld [vmem:[%s1234_s19 + $0x18] sm:$0xff] }
 0x11b   : > { %v376_v54 = vand.u32 2147483647, %v375_v49  ;;  %v464_v31 = vand.u32 2147483647, %v463_v26  ;;  %v506_v51 = vrot.slane %v221_v45, %v1294_v35 }
 0x11d   : > { %v380_v55 = vpop.permute.xlu1 %379  ;;  %v377_v60 = vadd.f32 %v376_v54, %v366_v53  ;;  %v490_v41 = vpop.permute.xlu0 %489 }
 0x11e   : > { %v386_v56 = vsub.f32 %v380_v55, %v385_v50  ;;  %v496_v50 = vsub.f32 %v490_v41, %v495_v40 }
 0x120   : > { %v387_v61 = vand.u32 2147483647, %v386_v56  ;;  %v497_v55 = vand.u32 2147483647, %v496_v50 }
 0x122   : > { %v388_v63 = vadd.f32 %v387_v61, %v377_v60  ;;  %v402_v1 = vpop.permute.xlu1 %401  ;;  %v528_v60 = vrot.slane %v221_v45, %v1298_v37  ;;  %v523_v61 = vpop.permute.xlu0 %522 }
 0x123   : > { %v408_v2 = vsub.f32 %v402_v1, %v407_v59  ;;  %v517_v59 = vrot.slane %v221_v45, %v1302_v39  ;;  %v561_v39 = vrot.slane %v221_v45, %v1313_v47  ;;  %v583_v47 = vrot.slane %v221_v45, %v1323_v5 }
 0x124   : > { %v399_v8 = vadd.f32 %v398_v0, %v388_v63 }
 0x125   : > { %v409_v9 = vand.u32 2147483647, %v408_v2  ;;  %v529_v2 = vsub.f32 %v523_v61, %v528_v60 }
 0x127   : > { %v413_v10 = vpop.permute.xlu1 %412  ;;  %v410_v7 = vadd.f32 %v409_v9, %v399_v8  ;;  %v530_v8 = vand.u32 2147483647, %v529_v2  ;;  %v556_v37 = vpop.permute.xlu0 %555 }
 0x128   : > { %v419_v11 = vsub.f32 %v413_v10, %v418_v3  ;;  %v539_v3 = vrot.slane %v221_v45, %v1305_v42  ;;  %v572_v42 = vrot.slane %v221_v45, %v1319_v58 }
 0x12a   : > { %v420_v14 = vand.u32 2147483647, %v419_v11  ;;  %v550_v11 = vrot.slane %v221_v45, %v1310_v46  ;;  %v225_v46 = vand.u32 127, %v222_v33 }
 0x12c   : > { %v421_v15 = vadd.f32 %v420_v14, %v410_v7  ;;  %v435_v17 = vpop.permute.xlu1 %434 }
 0x12d   : > { %v441_v18 = vsub.f32 %v435_v17, %v440_v13 }
 0x12e   : > { %v432_v22 = vadd.f32 %v431_v16, %v421_v15  ;;  %v562_v15 = vsub.f32 %v556_v37, %v561_v39 }
 0x12f   : > { %v442_v23 = vand.u32 2147483647, %v441_v18 }
 0x131   : > { %v446_v24 = vpop.permute.xlu1 %445  ;;  %v443_v28 = vadd.f32 %v442_v23, %v432_v22  ;;  %v226_v22 = vstv %s1241_s28  ;;  %v228_v23 = vstv %s1244_s7 }
 0x132   : > { %v452_v25 = vsub.f32 %v446_v24, %v451_v19  ;;  %v563_v19 = vand.u32 2147483647, %v562_v15  ;;  %vm227_vm0 = vcmp.lt.s32.totalorder %v1291_v34, %v226_v22  ;;  %vm229_vm1 = vcmp.lt.s32.totalorder %v225_v46, %v228_v23 }
 0x133   : > { %vm234_vm2 = vmand %vm227_vm0, %vm229_vm1 }
 0x134   : > { %v453_v29 = vand.u32 2147483647, %v452_v25 }
 0x136   : > { %v454_v30 = vadd.f32 %v453_v29, %v443_v28  ;;  %v468_v32 = vpop.permute.xlu1 %467 }
 0x137   : > { %v474_v36 = vsub.f32 %v468_v32, %v473_v27 }
 0x138   : > { %v465_v43 = vadd.f32 %v464_v31, %v454_v30 }
 0x139   : > { %v475_v44 = vand.u32 2147483647, %v474_v36 }
 0x13b   : > { %v479_v48 = vpop.permute.xlu1 %478  ;;  %v476_v52 = vadd.f32 %v475_v44, %v465_v43 }
 0x13c   : > { %v485_v49 = vsub.f32 %v479_v48, %v484_v38 }
 0x13e   : > { %v486_v53 = vand.u32 2147483647, %v485_v49 }
 0x140   : > { %v487_v54 = vadd.f32 %v486_v53, %v476_v52  ;;  %v501_v56 = vpop.permute.xlu1 %500 }
 0x141   : > { %v507_v57 = vsub.f32 %v501_v56, %v506_v51 }
 0x142   : > { %v498_v62 = vadd.f32 %v497_v55, %v487_v54 }
 0x143   : > { %v508_v63 = vand.u32 2147483647, %v507_v57 }
 0x145   : > { %v512_v0 = vpop.permute.xlu1 %511  ;;  %v509_v4 = vadd.f32 %v508_v63, %v498_v62 }
 0x146   : > { %v518_v1 = vsub.f32 %v512_v0, %v517_v59 }
 0x148   : > { %v519_v35 = vand.u32 2147483647, %v518_v1 }
 0x14a   : > { %v520_v6 = vadd.f32 %v519_v35, %v509_v4  ;;  %v534_v9 = vpop.permute.xlu1 %533 }
 0x14b   : > { %v540_v10 = vsub.f32 %v534_v9, %v539_v3 }
 0x14c   : > { %v531_v12 = vadd.f32 %v530_v8, %v520_v6 }
 0x14d   : > { %v541_v13 = vand.u32 2147483647, %v540_v10 }
 0x14f   : > { %v545_v7 = vpop.permute.xlu1 %544  ;;  %v542_v16 = vadd.f32 %v541_v13, %v531_v12 }
 0x150   : > { %v551_v14 = vsub.f32 %v545_v7, %v550_v11 }
 0x152   : > { %v552_v17 = vand.u32 2147483647, %v551_v14 }
 0x154   : > { %v553_v18 = vadd.f32 %v552_v17, %v542_v16  ;;  %v567_v20 = vpop.permute.xlu1 %566 }
 0x155   : > { %v573_v21 = vsub.f32 %v567_v20, %v572_v42 }
 0x156   : > { %v564_v24 = vadd.f32 %v563_v19, %v553_v18 }
 0x157   : > { %v574_v25 = vand.u32 2147483647, %v573_v21 }
 0x159   : > { %v578_v26 = vpop.permute.xlu1 %577  ;;  %v575_v27 = vadd.f32 %v574_v25, %v564_v24 }
 0x15a   : > { %v584_v58 = vsub.f32 %v578_v26, %v583_v47 }
 0x15c   : > { %v585_v28 = vand.u32 2147483647, %v584_v58 }
 0x15e   : > { %v586_v29 = vadd.f32 %v585_v28, %v575_v27 }
 0x160   : > { %v587_v30 = vsel %vm234_vm2, %v586_v29, 1e+32 }
 0x161   : > { %588 = vst [vmem:[%s1252_s12] sm:$0xff] %v587_v30 }
 0x162 PF: > { %591 = sbr.rel (!%p1248_p1) target bundleno = 361 (0x169), region = 44  ;;  %v1032_v33 = vmov (%p1248_p1), 1e+32  }
 0x163   : > { %592 = vst [vmem:[%s1252_s12] sm:$0xff] (%p1248_p1), %v1032_v33 }
 0x169 PF: > { %s713_s13 = sshll.u32 %s1095_s6, 7  ;;  %s607_s22 = sshll.u32 %s1252_s12, 4  ;;  %s608_s22 = int_to_ptr.vmem [resolvable:$true] %s607_s22 }
 0x16a   : > { %s1365_s20 = scalar_lea.hbm %s1407_s4, %s713_s13  ;;  %s594_s26 = scalar_lea.sflag [#allocation7], %s1224_s23 }
 0x16b   : > { %s920_s27 = scalar_lea.vmem %s608_s22, 128  ;;  %p1421_p2 = scmp.ne.s32.totalorder %s1413_s14, 0 }
 0x16c   : > { %p921_p4 = scmp.ne.s32.totalorder %s608_s22, %s920_s27  ;;  %s1033_s29 = smov [#allocation10]  }
 0x16d   : > { %s924_s25 = sshll.u32 %s1033_s29, 4  ;;  %s925_s25 = int_to_ptr.vmem [resolvable:$false] %s924_s25 }
 0x16e   : > { %p922_p3 = pnand %p921_p4, %p1421_p2  ;;  %s926_s9 = scalar_lea.vmem %s925_s25, 256 }
 0x16f   : > { %p927_p9 = scmp.lt.s32.totalorder %s608_s22, %s925_s25  ;;  %p928_p5 = scmp.lt.s32.totalorder %s926_s9, %s920_s27 }
 0x170   : > { %p923_p8 = pneg %p922_p3 }
 0x171   : > { %p929_p6 = por %p928_p5, %p927_p9 }
 0x173   : > { %p930_p10 = pnand %p929_p6, %p923_p8 }
 0x175   : > { %933 = shalt.err (!%p930_p10)
}
 0x176   : > { %s934_s6 = scalar_lea.hbm %s1365_s20, 128  ;;  %s938_s16 = scalar_lea.hbm %s1407_s4, 256 }
 0x177   : > { %p935_p12 = scmp.ne.s32.totalorder %s1365_s20, %s934_s6  ;;  %p939_p7 = scmp.lt.u32.totalorder %s1365_s20, %s1407_s4 }
 0x178   : > { %p940_p11 = scmp.lt.u32.totalorder %s938_s16, %s934_s6  ;;  %p942_p4 = scmp.lt.u32.totalorder %s934_s6, %s1365_s20 }
 0x179   : > { %p936_p13 = pnand %p935_p12, %p1421_p2 }
 0x17a   : > { %p941_p1 = por %p940_p11, %p939_p7 }
 0x17b   : > { %p937_p0 = pneg %p936_p13 }
 0x17c   : > { %p943_p3 = por %p942_p4, %p941_p1 }
 0x17e   : > { %p944_p8 = pnand %p943_p3, %p937_p0 }
 0x180   : > { %947 = shalt.err (!%p944_p8)
}
 0x181   : > { %721 = dma.vmem_to_hbm [thread:$0]  (%p1421_p2), %s608_s22, 128, %s1365_s20, %s594_s26  }
 0x182 PF: > { %s619_s28 = sand.u32 1, %s980_s0   ;;  %p1422_p9 = scmp.ne.s32.totalorder %s1414_s15, 0 }
 0x183   : > { %p1423_p5 = scmp.ge.s32.totalorder %s992_s5, 2  ;;  %s620_s7 = scalar_lea.sflag [#allocation7], %s619_s28 }
 0x185   : > { %p731_p6 = pnand %p1423_p5, %p1422_p9 }
 0x187   : > { %975 = dma.done.wait (!%p731_p6), %s620_s7, 128  }
 0x188   : > { %977 = vsyncadd (!%p731_p6), %s620_s7, 4294967168  ;;  %p28_p10 = scmp.ge.s32.totalorder %s1099_s8, 4   ;;  %s1424_s0 = smov %s984_s1 }
 0x189   : > { %s1425_s1 = smov %s988_s30  ;;  %s1426_s30 = smov %s1111_s11 }
 0x18a   : > { %s1427_s5 = smov %s1099_s8  ;;  %30 = sbr.rel (!%p28_p10) target bundleno = 29 (0x1d), region = 94 }
 0x191   :  { %625 = vsyncpa [#allocation6], 1 }
 0x192   :  { %627 = vsyncpa [#allocation6 + $0x1], 1 }
 0x193   :  { %628 = vsyncpa [#allocation9], 1 }
 0x194   :  { %630 = vsyncpa [#allocation9 + $0x1], 1 }
 0x195   :  { %631 = vsyncpa [#allocation7], 1 }
 0x196   :  { %633 = vsyncpa [#allocation7 + $0x1], 1 }

</bundles_post_ra>
